<compile_context>
chip_gen: v7x
topology: tpu7x:2x2x1
jax: 0.10.0
libtpu: 0.0.40
codegen_flags: <defaults>
</compile_context>

<pallas_src>
import functools

import jax
import jax.numpy as jnp
from jax.experimental import pallas as pl
from jax.experimental.pallas import tpu as pltpu


def _align8(n: int) -> int:
    return (n + 7) // 8 * 8


def _align128(n: int) -> int:
    return (n + 127) // 128 * 128


def _sigmoid(x):
    # sigmoid(x) == 0.5 * (tanh(x/2) + 1): one EUP tanh, no Newton-divide chain.
    return 0.5 * (jnp.tanh(0.5 * x) + 1.0)


def _lstm_mlp_kernel(x_ref, wih_ref, rec_ref, head_ref, o_ref, gx_ref, hbuf_ref, *,
                     seq_len, b_blk, in_dim, hidden, half, out_dim, slab_w):
    S, Bb, H = seq_len, b_blk, hidden
    rows = S * Bb

    # Static row offsets inside the packed parameter slabs (8-sublane aligned).
    r_bias = _align8(H)                      # rec slab: folded bias row
    r_b1 = _align8(H)                        # head slab: b1 row
    r_w2 = _align8(r_b1 + 1)                 # head slab: W_fc block start
    r_b2 = _align8(r_w2 + slab_w)            # head slab: b_fc row

    # ---- input-side LSTM gate pre-activations for ALL timesteps: one bf16 MXU
    #      matmul over the time-major (rows, IN) slab; spill to VMEM scratch.
    x2 = x_ref[...]                                          # (rows, IN)  bf16
    wih_t = wih_ref[0:in_dim, :]                             # (IN, 4H)    bf16
    bias = rec_ref[r_bias:r_bias + 1, :]                     # (1, 4H)     f32 (b_ih+b_hh)
    gx_ref[...] = jnp.dot(x2, wih_t, preferred_element_type=jnp.float32) + bias

    # ---- LSTM recurrence (serial critical path), f32 state, static unroll.
    whh_t = rec_ref[0:H, :]                                  # (H, 4H) f32
    h = jnp.zeros((Bb, H), jnp.float32)
    c = jnp.zeros((Bb, H), jnp.float32)
    for t in range(S):                                       # static unroll (S small)
        g = gx_ref[t * Bb:(t + 1) * Bb, :]                   # contiguous, 8-aligned
        if t > 0:                                            # h0 == 0
            g = g + jnp.dot(h, whh_t, preferred_element_type=jnp.float32)
        sig = _sigmoid(g)                                    # one pass over all 4H lanes
        tnh = jnp.tanh(g)                                    # one pass over all 4H lanes
        i = sig[:, 0:H]                                      # PyTorch gate order [i,f,g,o]
        f = sig[:, H:2 * H]
        gg = tnh[:, 2 * H:3 * H]
        o = sig[:, 3 * H:4 * H]
        c = f * c + i * gg
        h = o * jnp.tanh(c)
        hbuf_ref[t * Bb:(t + 1) * Bb, :] = h                 # unmasked aligned store

    # ---- head: Dropout(identity) -> Linear -> ReLU -> Linear, flat bf16 matmuls.
    h_all = hbuf_ref[...].astype(jnp.bfloat16)               # (rows, H)
    w1_t = head_ref[0:H, :]                                  # (H, SLAB_W)      bf16
    b1 = head_ref[r_b1:r_b1 + 1, :].astype(jnp.float32)      # (1, SLAB_W)
    w2 = head_ref[r_w2:r_w2 + slab_w, :]                     # (SLAB_W, SLAB_W) bf16
    b2 = head_ref[r_b2:r_b2 + 1, :].astype(jnp.float32)      # (1, SLAB_W)

    y = jnp.maximum(jnp.dot(h_all, w1_t, preferred_element_type=jnp.float32) + b1, 0.0)
    pred = jnp.dot(y.astype(jnp.bfloat16), w2, preferred_element_type=jnp.float32) + b2
    o_ref[...] = pred.astype(o_ref.dtype)                    # lane-dense (rows, 128) store


def pack_params(w_ih, w_hh, b_ih, b_hh, w1, b1, wfc, bfc):
    """One-time packing of PyTorch-layout params into three VMEM slabs."""
    four_h, in_dim = w_ih.shape
    H = four_h // 4
    half = w1.shape[0]
    out_dim = wfc.shape[0]
    slab_w = max(128, _align128(half), _align128(out_dim))   # lane-dense head width

    # (1) input-side LSTM weights, bf16, pre-transposed: (IN_pad8, 4H).
    wih_slab = jnp.zeros((_align8(in_dim), 4 * H), jnp.bfloat16)
    wih_slab = wih_slab.at[0:in_dim, :].set(w_ih.T.astype(jnp.bfloat16))

    # (2) recurrent path stays f32 (serial accuracy): [W_hh^T ; (b_ih + b_hh)].
    r_bias = _align8(H)
    rec_slab = jnp.zeros((_align8(r_bias + 1), 4 * H), jnp.float32)
    rec_slab = rec_slab.at[0:H, :].set(w_hh.T.astype(jnp.float32))
    rec_slab = rec_slab.at[r_bias, :].set((b_ih + b_hh).astype(jnp.float32))

    # (3) head slab, bf16, lane-dense: [W1^T ; b1 ; W_fc block ; b_fc], zero-padded.
    r_b1 = _align8(H)
    r_w2 = _align8(r_b1 + 1)
    r_b2 = _align8(r_w2 + slab_w)
    head_slab = jnp.zeros((_align8(r_b2 + 1), slab_w), jnp.bfloat16)
    head_slab = head_slab.at[0:H, 0:half].set(w1.T.astype(jnp.bfloat16))
    head_slab = head_slab.at[r_b1, 0:half].set(b1.astype(jnp.bfloat16))
    head_slab = head_slab.at[r_w2:r_w2 + half, 0:out_dim].set(wfc.T.astype(jnp.bfloat16))
    head_slab = head_slab.at[r_b2, 0:out_dim].set(bfc.astype(jnp.bfloat16))

    dims = dict(in_dim=in_dim, hidden=H, half=half, out_dim=out_dim, slab_w=slab_w)
    return wih_slab, rec_slab, head_slab, dims


def audio_to_joints_forward(x, wih_slab, rec_slab, head_slab, dims, *, b_blk=None):
    B, S, in_dim = x.shape
    H, out_dim, slab_w = dims["hidden"], dims["out_dim"], dims["slab_w"]

    # Batch block: >= 8 sublanes; up to 64 (>=512 matmul rows/block) — sized to fit
    # v7x's 64 MiB physical / 32 MiB default-scoped VMEM with double buffering.
    if b_blk is None:
        b_blk = min(64, _align8(B))
    b_blk = max(8, _align8(b_blk))
    nb = pl.cdiv(B, b_blk)
    B_pad = nb * b_blk
    rows = S * b_blk

    # Wrapper-side layout plumbing: pad batch, go time-major inside each batch
    # block, flatten to a lane/sublane-friendly 2-D slab, cast MXU operand to bf16.
    xp = jnp.zeros((B_pad, S, in_dim), jnp.bfloat16).at[:B].set(x.astype(jnp.bfloat16))
    x_tm = (xp.reshape(nb, b_blk, S, in_dim)
              .transpose(0, 2, 1, 3)                  # (nb, S, b_blk, IN) time-major
              .reshape(nb * rows, in_dim))

    kernel = functools.partial(_lstm_mlp_kernel, seq_len=S, b_blk=b_blk,
                               in_dim=in_dim, hidden=H, half=dims["half"],
                               out_dim=out_dim, slab_w=slab_w)

    def _full_spec(a):
        n = a.ndim
        return pl.BlockSpec(a.shape, lambda b, n=n: (0,) * n)

    out = pl.pallas_call(
        kernel,
        out_shape=jax.ShapeDtypeStruct((nb * rows, slab_w), jnp.float32),
        grid_spec=pltpu.PrefetchScalarGridSpec(
            num_scalar_prefetch=0,
            grid=(nb,),
            in_specs=[
                pl.BlockSpec((rows, in_dim), lambda b: (b, 0)),   # x block (double-buffered)
                _full_spec(wih_slab),                             # resident weight slabs
                _full_spec(rec_slab),
                _full_spec(head_slab),
            ],
            out_specs=pl.BlockSpec((rows, slab_w), lambda b: (b, 0)),
            scratch_shapes=[
                pltpu.VMEM((rows, 4 * H), jnp.float32),           # gx spill (bounded vregs)
                pltpu.VMEM((rows, H), jnp.float32),               # per-step hidden states
            ],
        ),
        compiler_params=pltpu.CompilerParams(
            dimension_semantics=("parallel",),        # both v7x TCs; no-op on v5e/v6e
            vmem_limit_bytes=32 * 1024 * 1024,        # above v5e's 16 MiB default scope
        ),
    )(x_tm, wih_slab, rec_slab, head_slab)

    # (nb*S*b_blk, SLAB_W) time-major -> (B, S, OUT): wrapper-side layout plumbing.
    out = (out.reshape(nb, S, b_blk, slab_w)
              .transpose(0, 2, 1, 3)
              .reshape(B_pad, S, slab_w))
    return out[:B, :, :out_dim]


def reference_forward(x, raw_params):
    """Pure-JAX reference matching PyTorch semantics (inference-mode dropout)."""
    w_ih, w_hh, b_ih, b_hh, w1, b1, wfc, bfc = raw_params
    B, S, _ = x.shape
    H = w_hh.shape[1]
    xs = jnp.swapaxes(x, 0, 1).astype(jnp.float32)        # (S, B, IN)

    def step(carry, x_t):
        h, c = carry
        g = x_t @ w_ih.T + b_ih + h @ w_hh.T + b_hh
        i, f, gg, o = jnp.split(g, 4, axis=-1)
        i = jax.nn.sigmoid(i)
        f = jax.nn.sigmoid(f)
        gg = jnp.tanh(gg)
        o = jax.nn.sigmoid(o)
        c = f * c + i * gg
        h = o * jnp.tanh(c)
        return (h, c), h

    init = (jnp.zeros((B, H), jnp.float32), jnp.zeros((B, H), jnp.float32))
    _, hs = jax.lax.scan(step, init, xs)                   # (S, B, H)
    out = jnp.swapaxes(hs, 0, 1).reshape(-1, H)            # output.reshape(-1, hidden)
    y = jnp.maximum(out @ w1.T + b1, 0.0)                  # linear_one + relu
    pred = y @ wfc.T + bfc                                 # fc
    return pred.reshape(B, S, -1)


def _bf16_round(a):
    return a.astype(jnp.bfloat16).astype(jnp.float32)


if __name__ == "__main__":
    # Small shapes consistent with the module:
    # batch=2, seq_len=8, input_dim=32, hidden_dim=32 (hidden/2 = 16), output_dim=16
    B, S, IN, H, OUT = 2, 8, 32, 32, 16
    H2 = H // 2
    key = jax.random.PRNGKey(0)
    ks = jax.random.split(key, 8)

    # LSTM params (PyTorch layout: (4H, dim) weights, gate order [i,f,g,o]),
    # xavier-normal weights, uniform(0.25, 0.5) biases, as in initialize().
    w_ih = jax.random.normal(ks[0], (4 * H, IN), jnp.float32) * (2.0 / (4 * H + IN)) ** 0.5
    w_hh = jax.random.normal(ks[1], (4 * H, H), jnp.float32) * (2.0 / (4 * H + H)) ** 0.5
    b_ih = jax.random.uniform(ks[2], (4 * H,), jnp.float32, 0.25, 0.5)
    b_hh = jax.random.uniform(ks[3], (4 * H,), jnp.float32, 0.25, 0.5)
    # linear_one (H -> H/2), fc (H/2 -> OUT) xavier weight / zero bias.
    w1 = jax.random.uniform(ks[4], (H2, H), jnp.float32, -1.0, 1.0) / jnp.sqrt(H)
    b1 = jax.random.uniform(ks[5], (H2,), jnp.float32, -1.0, 1.0) / jnp.sqrt(H)
    wfc = jax.random.normal(ks[6], (OUT, H2), jnp.float32) * (2.0 / (OUT + H2)) ** 0.5
    bfc = jnp.zeros((OUT,), jnp.float32)

    x = jax.random.normal(ks[7], (B, S, IN), jnp.float32)

    wih_slab, rec_slab, head_slab, dims = pack_params(w_ih, w_hh, b_ih, b_hh, w1, b1, wfc, bfc)
    out = audio_to_joints_forward(x, wih_slab, rec_slab, head_slab, dims)
    out = jax.block_until_ready(out)

    # Reference with the same bf16-rounded params/input where the kernel uses bf16
    # (recurrent W_hh and the folded LSTM bias stay f32 in both).
    qparams = (_bf16_round(w_ih), w_hh, b_ih, b_hh,
               _bf16_round(w1), _bf16_round(b1), _bf16_round(wfc), _bf16_round(bfc))
    ref = reference_forward(_bf16_round(x), qparams)

    assert out.shape == (B, S, OUT)
    assert jnp.allclose(out, ref, atol=3e-2, rtol=3e-2), "mismatch vs reference"
    print("KERNEL_OK")
</pallas_src>

<mosaic_0001>
module attributes {stable_mosaic.version = 11 : i64} {
  func.func @_lstm_mlp_kernel(%arg0: i32, %arg1: memref<64x32xbf16, #tpu.memory_space<vmem>>, %arg2: memref<32x128xbf16, #tpu.memory_space<vmem>>, %arg3: memref<40x128xf32, #tpu.memory_space<vmem>>, %arg4: memref<176x128xbf16, #tpu.memory_space<vmem>>, %arg5: memref<64x128xf32, #tpu.memory_space<vmem>>, %arg6: memref<64x128xf32, #tpu.memory_space<vmem>>, %arg7: memref<64x32xf32, #tpu.memory_space<vmem>>) attributes {dimension_semantics = [#tpu.dimension_semantics<parallel>], iteration_bounds = array<i64: 1>, scalar_prefetch = 0 : i64, scratch_operands = 2 : i64, tpu.core_type = #tpu.core_type<tc>, window_params = [{transform_indices = @transform_0, window_bounds = array<i64: 64, 32>}, {pipeline_mode = #tpu.pipeline_mode<synchronous>, transform_indices = @transform_1, window_bounds = array<i64: 32, 128>}, {pipeline_mode = #tpu.pipeline_mode<synchronous>, transform_indices = @transform_2, window_bounds = array<i64: 40, 128>}, {pipeline_mode = #tpu.pipeline_mode<synchronous>, transform_indices = @transform_3, window_bounds = array<i64: 176, 128>}, {transform_indices = @transform_4, window_bounds = array<i64: 64, 128>}]} {
    %c0 = arith.constant 0 : index
    %c0_0 = arith.constant 0 : index
    %0 = vector.load %arg1[%c0, %c0_0] : memref<64x32xbf16, #tpu.memory_space<vmem>>, vector<64x32xbf16>
    %c0_1 = arith.constant 0 : index
    %c0_2 = arith.constant 0 : index
    %1 = vector.load %arg2[%c0_1, %c0_2] : memref<32x128xbf16, #tpu.memory_space<vmem>>, vector<32x128xbf16>
    %c32 = arith.constant 32 : index
    %c0_3 = arith.constant 0 : index
    %2 = vector.load %arg3[%c32, %c0_3] : memref<40x128xf32, #tpu.memory_space<vmem>>, vector<1x128xf32>
    %cst = arith.constant dense<0.000000e+00> : vector<64x128xf32>
    %3 = tpu.matmul %0, %1, %cst {dimension_numbers = #tpu.dot_dimension_numbers<[1], [0], [0], [1], [0, 0, 1, 1], [], []>} : vector<64x32xbf16>, vector<32x128xbf16>, vector<64x128xf32> -> vector<64x128xf32>
    %4 = vector.broadcast %2 : vector<1x128xf32> to vector<64x128xf32>
    %5 = arith.addf %3, %4 : vector<64x128xf32>
    %c0_4 = arith.constant 0 : index
    %c0_5 = arith.constant 0 : index
    %6 = vector.load %arg6[%c0_4, %c0_5] : memref<64x128xf32, #tpu.memory_space<vmem>>, vector<64x128xf32>
    tpu.vector_store %arg6[%c0_4, %c0_5], %5 {strides = array<i32>} : memref<64x128xf32, #tpu.memory_space<vmem>>, vector<64x128xf32>,
    %c0_6 = arith.constant 0 : index
    %c0_7 = arith.constant 0 : index
    %7 = vector.load %arg3[%c0_6, %c0_7] : memref<40x128xf32, #tpu.memory_space<vmem>>, vector<32x128xf32>
    %cst_8 = arith.constant 0.000000e+00 : f32
    %8 = vector.broadcast %cst_8 : f32 to vector<8x32xf32>
    %c0_9 = arith.constant 0 : index
    %c0_10 = arith.constant 0 : index
    %9 = vector.load %arg6[%c0_9, %c0_10] : memref<64x128xf32, #tpu.memory_space<vmem>>, vector<8x128xf32>
    %cst_11 = arith.constant 5.000000e-01 : f32
    %10 = vector.broadcast %cst_11 : f32 to vector<8x128xf32>
    %11 = arith.mulf %10, %9 : vector<8x128xf32>
    %12 = math.tanh %11 : vector<8x128xf32>
    %cst_12 = arith.constant 1.000000e+00 : f32
    %13 = vector.broadcast %cst_12 : f32 to vector<8x128xf32>
    %14 = arith.addf %12, %13 : vector<8x128xf32>
    %cst_13 = arith.constant 5.000000e-01 : f32
    %15 = vector.broadcast %cst_13 : f32 to vector<8x128xf32>
    %16 = arith.mulf %15, %14 : vector<8x128xf32>
    %17 = math.tanh %9 : vector<8x128xf32>
    %18 = vector.extract_strided_slice %16 {offsets = [0, 0], sizes = [8, 32], strides = [1, 1]} : vector<8x128xf32> to vector<8x32xf32>
    %19 = vector.extract_strided_slice %16 {offsets = [0, 32], sizes = [8, 32], strides = [1, 1]} : vector<8x128xf32> to vector<8x32xf32>
    %20 = vector.extract_strided_slice %17 {offsets = [0, 64], sizes = [8, 32], strides = [1, 1]} : vector<8x128xf32> to vector<8x32xf32>
    %21 = vector.extract_strided_slice %16 {offsets = [0, 96], sizes = [8, 32], strides = [1, 1]} : vector<8x128xf32> to vector<8x32xf32>
    %22 = arith.mulf %19, %8 : vector<8x32xf32>
    %23 = arith.mulf %18, %20 : vector<8x32xf32>
    %24 = arith.addf %22, %23 : vector<8x32xf32>
    %25 = math.tanh %24 : vector<8x32xf32>
    %26 = arith.mulf %21, %25 : vector<8x32xf32>
    %c0_14 = arith.constant 0 : index
    %c0_15 = arith.constant 0 : index
    %27 = vector.load %arg7[%c0_14, %c0_15] : memref<64x32xf32, #tpu.memory_space<vmem>>, vector<8x32xf32>
    tpu.vector_store %arg7[%c0_14, %c0_15], %26 {strides = array<i32>} : memref<64x32xf32, #tpu.memory_space<vmem>>, vector<8x32xf32>,
    %c8 = arith.constant 8 : index
    %c0_16 = arith.constant 0 : index
    %28 = vector.load %arg6[%c8, %c0_16] : memref<64x128xf32, #tpu.memory_space<vmem>>, vector<8x128xf32>
    %cst_17 = arith.constant dense<0.000000e+00> : vector<8x128xf32>
    %29 = tpu.matmul %26, %7, %cst_17 {dimension_numbers = #tpu.dot_dimension_numbers<[1], [0], [0], [1], [0, 0, 1, 1], [], []>} : vector<8x32xf32>, vector<32x128xf32>, vector<8x128xf32> -> vector<8x128xf32>
    %30 = arith.addf %28, %29 : vector<8x128xf32>
    %cst_18 = arith.constant 5.000000e-01 : f32
    %31 = vector.broadcast %cst_18 : f32 to vector<8x128xf32>
    %32 = arith.mulf %31, %30 : vector<8x128xf32>
    %33 = math.tanh %32 : vector<8x128xf32>
    %cst_19 = arith.constant 1.000000e+00 : f32
    %34 = vector.broadcast %cst_19 : f32 to vector<8x128xf32>
    %35 = arith.addf %33, %34 : vector<8x128xf32>
    %cst_20 = arith.constant 5.000000e-01 : f32
    %36 = vector.broadcast %cst_20 : f32 to vector<8x128xf32>
    %37 = arith.mulf %36, %35 : vector<8x128xf32>
    %38 = math.tanh %30 : vector<8x128xf32>
    %39 = vector.extract_strided_slice %37 {offsets = [0, 0], sizes = [8, 32], strides = [1, 1]} : vector<8x128xf32> to vector<8x32xf32>
    %40 = vector.extract_strided_slice %37 {offsets = [0, 32], sizes = [8, 32], strides = [1, 1]} : vector<8x128xf32> to vector<8x32xf32>
    %41 = vector.extract_strided_slice %38 {offsets = [0, 64], sizes = [8, 32], strides = [1, 1]} : vector<8x128xf32> to vector<8x32xf32>
    %42 = vector.extract_strided_slice %37 {offsets = [0, 96], sizes = [8, 32], strides = [1, 1]} : vector<8x128xf32> to vector<8x32xf32>
    %43 = arith.mulf %40, %24 : vector<8x32xf32>
    %44 = arith.mulf %39, %41 : vector<8x32xf32>
    %45 = arith.addf %43, %44 : vector<8x32xf32>
    %46 = math.tanh %45 : vector<8x32xf32>
    %47 = arith.mulf %42, %46 : vector<8x32xf32>
    %c8_21 = arith.constant 8 : index
    %c0_22 = arith.constant 0 : index
    %48 = vector.load %arg7[%c8_21, %c0_22] : memref<64x32xf32, #tpu.memory_space<vmem>>, vector<8x32xf32>
    tpu.vector_store %arg7[%c8_21, %c0_22], %47 {strides = array<i32>} : memref<64x32xf32, #tpu.memory_space<vmem>>, vector<8x32xf32>,
    %c16 = arith.constant 16 : index
    %c0_23 = arith.constant 0 : index
    %49 = vector.load %arg6[%c16, %c0_23] : memref<64x128xf32, #tpu.memory_space<vmem>>, vector<8x128xf32>
    %cst_24 = arith.constant dense<0.000000e+00> : vector<8x128xf32>
    %50 = tpu.matmul %47, %7, %cst_24 {dimension_numbers = #tpu.dot_dimension_numbers<[1], [0], [0], [1], [0, 0, 1, 1], [], []>} : vector<8x32xf32>, vector<32x128xf32>, vector<8x128xf32> -> vector<8x128xf32>
    %51 = arith.addf %49, %50 : vector<8x128xf32>
    %cst_25 = arith.constant 5.000000e-01 : f32
    %52 = vector.broadcast %cst_25 : f32 to vector<8x128xf32>
    %53 = arith.mulf %52, %51 : vector<8x128xf32>
    %54 = math.tanh %53 : vector<8x128xf32>
    %cst_26 = arith.constant 1.000000e+00 : f32
    %55 = vector.broadcast %cst_26 : f32 to vector<8x128xf32>
    %56 = arith.addf %54, %55 : vector<8x128xf32>
    %cst_27 = arith.constant 5.000000e-01 : f32
    %57 = vector.broadcast %cst_27 : f32 to vector<8x128xf32>
    %58 = arith.mulf %57, %56 : vector<8x128xf32>
    %59 = math.tanh %51 : vector<8x128xf32>
    %60 = vector.extract_strided_slice %58 {offsets = [0, 0], sizes = [8, 32], strides = [1, 1]} : vector<8x128xf32> to vector<8x32xf32>
    %61 = vector.extract_strided_slice %58 {offsets = [0, 32], sizes = [8, 32], strides = [1, 1]} : vector<8x128xf32> to vector<8x32xf32>
    %62 = vector.extract_strided_slice %59 {offsets = [0, 64], sizes = [8, 32], strides = [1, 1]} : vector<8x128xf32> to vector<8x32xf32>
    %63 = vector.extract_strided_slice %58 {offsets = [0, 96], sizes = [8, 32], strides = [1, 1]} : vector<8x128xf32> to vector<8x32xf32>
    %64 = arith.mulf %61, %45 : vector<8x32xf32>
    %65 = arith.mulf %60, %62 : vector<8x32xf32>
    %66 = arith.addf %64, %65 : vector<8x32xf32>
    %67 = math.tanh %66 : vector<8x32xf32>
    %68 = arith.mulf %63, %67 : vector<8x32xf32>
    %c16_28 = arith.constant 16 : index
    %c0_29 = arith.constant 0 : index
    %69 = vector.load %arg7[%c16_28, %c0_29] : memref<64x32xf32, #tpu.memory_space<vmem>>, vector<8x32xf32>
    tpu.vector_store %arg7[%c16_28, %c0_29], %68 {strides = array<i32>} : memref<64x32xf32, #tpu.memory_space<vmem>>, vector<8x32xf32>,
    %c24 = arith.constant 24 : index
    %c0_30 = arith.constant 0 : index
    %70 = vector.load %arg6[%c24, %c0_30] : memref<64x128xf32, #tpu.memory_space<vmem>>, vector<8x128xf32>
    %cst_31 = arith.constant dense<0.000000e+00> : vector<8x128xf32>
    %71 = tpu.matmul %68, %7, %cst_31 {dimension_numbers = #tpu.dot_dimension_numbers<[1], [0], [0], [1], [0, 0, 1, 1], [], []>} : vector<8x32xf32>, vector<32x128xf32>, vector<8x128xf32> -> vector<8x128xf32>
    %72 = arith.addf %70, %71 : vector<8x128xf32>
    %cst_32 = arith.constant 5.000000e-01 : f32
    %73 = vector.broadcast %cst_32 : f32 to vector<8x128xf32>
    %74 = arith.mulf %73, %72 : vector<8x128xf32>
    %75 = math.tanh %74 : vector<8x128xf32>
    %cst_33 = arith.constant 1.000000e+00 : f32
    %76 = vector.broadcast %cst_33 : f32 to vector<8x128xf32>
    %77 = arith.addf %75, %76 : vector<8x128xf32>
    %cst_34 = arith.constant 5.000000e-01 : f32
    %78 = vector.broadcast %cst_34 : f32 to vector<8x128xf32>
    %79 = arith.mulf %78, %77 : vector<8x128xf32>
    %80 = math.tanh %72 : vector<8x128xf32>
    %81 = vector.extract_strided_slice %79 {offsets = [0, 0], sizes = [8, 32], strides = [1, 1]} : vector<8x128xf32> to vector<8x32xf32>
    %82 = vector.extract_strided_slice %79 {offsets = [0, 32], sizes = [8, 32], strides = [1, 1]} : vector<8x128xf32> to vector<8x32xf32>
    %83 = vector.extract_strided_slice %80 {offsets = [0, 64], sizes = [8, 32], strides = [1, 1]} : vector<8x128xf32> to vector<8x32xf32>
    %84 = vector.extract_strided_slice %79 {offsets = [0, 96], sizes = [8, 32], strides = [1, 1]} : vector<8x128xf32> to vector<8x32xf32>
    %85 = arith.mulf %82, %66 : vector<8x32xf32>
    %86 = arith.mulf %81, %83 : vector<8x32xf32>
    %87 = arith.addf %85, %86 : vector<8x32xf32>
    %88 = math.tanh %87 : vector<8x32xf32>
    %89 = arith.mulf %84, %88 : vector<8x32xf32>
    %c24_35 = arith.constant 24 : index
    %c0_36 = arith.constant 0 : index
    %90 = vector.load %arg7[%c24_35, %c0_36] : memref<64x32xf32, #tpu.memory_space<vmem>>, vector<8x32xf32>
    tpu.vector_store %arg7[%c24_35, %c0_36], %89 {strides = array<i32>} : memref<64x32xf32, #tpu.memory_space<vmem>>, vector<8x32xf32>,
    %c32_37 = arith.constant 32 : index
    %c0_38 = arith.constant 0 : index
    %91 = vector.load %arg6[%c32_37, %c0_38] : memref<64x128xf32, #tpu.memory_space<vmem>>, vector<8x128xf32>
    %cst_39 = arith.constant dense<0.000000e+00> : vector<8x128xf32>
    %92 = tpu.matmul %89, %7, %cst_39 {dimension_numbers = #tpu.dot_dimension_numbers<[1], [0], [0], [1], [0, 0, 1, 1], [], []>} : vector<8x32xf32>, vector<32x128xf32>, vector<8x128xf32> -> vector<8x128xf32>
    %93 = arith.addf %91, %92 : vector<8x128xf32>
    %cst_40 = arith.constant 5.000000e-01 : f32
    %94 = vector.broadcast %cst_40 : f32 to vector<8x128xf32>
    %95 = arith.mulf %94, %93 : vector<8x128xf32>
    %96 = math.tanh %95 : vector<8x128xf32>
    %cst_41 = arith.constant 1.000000e+00 : f32
    %97 = vector.broadcast %cst_41 : f32 to vector<8x128xf32>
    %98 = arith.addf %96, %97 : vector<8x128xf32>
    %cst_42 = arith.constant 5.000000e-01 : f32
    %99 = vector.broadcast %cst_42 : f32 to vector<8x128xf32>
    %100 = arith.mulf %99, %98 : vector<8x128xf32>
    %101 = math.tanh %93 : vector<8x128xf32>
    %102 = vector.extract_strided_slice %100 {offsets = [0, 0], sizes = [8, 32], strides = [1, 1]} : vector<8x128xf32> to vector<8x32xf32>
    %103 = vector.extract_strided_slice %100 {offsets = [0, 32], sizes = [8, 32], strides = [1, 1]} : vector<8x128xf32> to vector<8x32xf32>
    %104 = vector.extract_strided_slice %101 {offsets = [0, 64], sizes = [8, 32], strides = [1, 1]} : vector<8x128xf32> to vector<8x32xf32>
    %105 = vector.extract_strided_slice %100 {offsets = [0, 96], sizes = [8, 32], strides = [1, 1]} : vector<8x128xf32> to vector<8x32xf32>
    %106 = arith.mulf %103, %87 : vector<8x32xf32>
    %107 = arith.mulf %102, %104 : vector<8x32xf32>
    %108 = arith.addf %106, %107 : vector<8x32xf32>
    %109 = math.tanh %108 : vector<8x32xf32>
    %110 = arith.mulf %105, %109 : vector<8x32xf32>
    %c32_43 = arith.constant 32 : index
    %c0_44 = arith.constant 0 : index
    %111 = vector.load %arg7[%c32_43, %c0_44] : memref<64x32xf32, #tpu.memory_space<vmem>>, vector<8x32xf32>
    tpu.vector_store %arg7[%c32_43, %c0_44], %110 {strides = array<i32>} : memref<64x32xf32, #tpu.memory_space<vmem>>, vector<8x32xf32>,
    %c40 = arith.constant 40 : index
    %c0_45 = arith.constant 0 : index
    %112 = vector.load %arg6[%c40, %c0_45] : memref<64x128xf32, #tpu.memory_space<vmem>>, vector<8x128xf32>
    %cst_46 = arith.constant dense<0.000000e+00> : vector<8x128xf32>
    %113 = tpu.matmul %110, %7, %cst_46 {dimension_numbers = #tpu.dot_dimension_numbers<[1], [0], [0], [1], [0, 0, 1, 1], [], []>} : vector<8x32xf32>, vector<32x128xf32>, vector<8x128xf32> -> vector<8x128xf32>
    %114 = arith.addf %112, %113 : vector<8x128xf32>
    %cst_47 = arith.constant 5.000000e-01 : f32
    %115 = vector.broadcast %cst_47 : f32 to vector<8x128xf32>
    %116 = arith.mulf %115, %114 : vector<8x128xf32>
    %117 = math.tanh %116 : vector<8x128xf32>
    %cst_48 = arith.constant 1.000000e+00 : f32
    %118 = vector.broadcast %cst_48 : f32 to vector<8x128xf32>
    %119 = arith.addf %117, %118 : vector<8x128xf32>
    %cst_49 = arith.constant 5.000000e-01 : f32
    %120 = vector.broadcast %cst_49 : f32 to vector<8x128xf32>
    %121 = arith.mulf %120, %119 : vector<8x128xf32>
    %122 = math.tanh %114 : vector<8x128xf32>
    %123 = vector.extract_strided_slice %121 {offsets = [0, 0], sizes = [8, 32], strides = [1, 1]} : vector<8x128xf32> to vector<8x32xf32>
    %124 = vector.extract_strided_slice %121 {offsets = [0, 32], sizes = [8, 32], strides = [1, 1]} : vector<8x128xf32> to vector<8x32xf32>
    %125 = vector.extract_strided_slice %122 {offsets = [0, 64], sizes = [8, 32], strides = [1, 1]} : vector<8x128xf32> to vector<8x32xf32>
    %126 = vector.extract_strided_slice %121 {offsets = [0, 96], sizes = [8, 32], strides = [1, 1]} : vector<8x128xf32> to vector<8x32xf32>
    %127 = arith.mulf %124, %108 : vector<8x32xf32>
    %128 = arith.mulf %123, %125 : vector<8x32xf32>
    %129 = arith.addf %127, %128 : vector<8x32xf32>
    %130 = math.tanh %129 : vector<8x32xf32>
    %131 = arith.mulf %126, %130 : vector<8x32xf32>
    %c40_50 = arith.constant 40 : index
    %c0_51 = arith.constant 0 : index
    %132 = vector.load %arg7[%c40_50, %c0_51] : memref<64x32xf32, #tpu.memory_space<vmem>>, vector<8x32xf32>
    tpu.vector_store %arg7[%c40_50, %c0_51], %131 {strides = array<i32>} : memref<64x32xf32, #tpu.memory_space<vmem>>, vector<8x32xf32>,
    %c48 = arith.constant 48 : index
    %c0_52 = arith.constant 0 : index
    %133 = vector.load %arg6[%c48, %c0_52] : memref<64x128xf32, #tpu.memory_space<vmem>>, vector<8x128xf32>
    %cst_53 = arith.constant dense<0.000000e+00> : vector<8x128xf32>
    %134 = tpu.matmul %131, %7, %cst_53 {dimension_numbers = #tpu.dot_dimension_numbers<[1], [0], [0], [1], [0, 0, 1, 1], [], []>} : vector<8x32xf32>, vector<32x128xf32>, vector<8x128xf32> -> vector<8x128xf32>
    %135 = arith.addf %133, %134 : vector<8x128xf32>
    %cst_54 = arith.constant 5.000000e-01 : f32
    %136 = vector.broadcast %cst_54 : f32 to vector<8x128xf32>
    %137 = arith.mulf %136, %135 : vector<8x128xf32>
    %138 = math.tanh %137 : vector<8x128xf32>
    %cst_55 = arith.constant 1.000000e+00 : f32
    %139 = vector.broadcast %cst_55 : f32 to vector<8x128xf32>
    %140 = arith.addf %138, %139 : vector<8x128xf32>
    %cst_56 = arith.constant 5.000000e-01 : f32
    %141 = vector.broadcast %cst_56 : f32 to vector<8x128xf32>
    %142 = arith.mulf %141, %140 : vector<8x128xf32>
    %143 = math.tanh %135 : vector<8x128xf32>
    %144 = vector.extract_strided_slice %142 {offsets = [0, 0], sizes = [8, 32], strides = [1, 1]} : vector<8x128xf32> to vector<8x32xf32>
    %145 = vector.extract_strided_slice %142 {offsets = [0, 32], sizes = [8, 32], strides = [1, 1]} : vector<8x128xf32> to vector<8x32xf32>
    %146 = vector.extract_strided_slice %143 {offsets = [0, 64], sizes = [8, 32], strides = [1, 1]} : vector<8x128xf32> to vector<8x32xf32>
    %147 = vector.extract_strided_slice %142 {offsets = [0, 96], sizes = [8, 32], strides = [1, 1]} : vector<8x128xf32> to vector<8x32xf32>
    %148 = arith.mulf %145, %129 : vector<8x32xf32>
    %149 = arith.mulf %144, %146 : vector<8x32xf32>
    %150 = arith.addf %148, %149 : vector<8x32xf32>
    %151 = math.tanh %150 : vector<8x32xf32>
    %152 = arith.mulf %147, %151 : vector<8x32xf32>
    %c48_57 = arith.constant 48 : index
    %c0_58 = arith.constant 0 : index
    %153 = vector.load %arg7[%c48_57, %c0_58] : memref<64x32xf32, #tpu.memory_space<vmem>>, vector<8x32xf32>
    tpu.vector_store %arg7[%c48_57, %c0_58], %152 {strides = array<i32>} : memref<64x32xf32, #tpu.memory_space<vmem>>, vector<8x32xf32>,
    %c56 = arith.constant 56 : index
    %c0_59 = arith.constant 0 : index
    %154 = vector.load %arg6[%c56, %c0_59] : memref<64x128xf32, #tpu.memory_space<vmem>>, vector<8x128xf32>
    %cst_60 = arith.constant dense<0.000000e+00> : vector<8x128xf32>
    %155 = tpu.matmul %152, %7, %cst_60 {dimension_numbers = #tpu.dot_dimension_numbers<[1], [0], [0], [1], [0, 0, 1, 1], [], []>} : vector<8x32xf32>, vector<32x128xf32>, vector<8x128xf32> -> vector<8x128xf32>
    %156 = arith.addf %154, %155 : vector<8x128xf32>
    %cst_61 = arith.constant 5.000000e-01 : f32
    %157 = vector.broadcast %cst_61 : f32 to vector<8x128xf32>
    %158 = arith.mulf %157, %156 : vector<8x128xf32>
    %159 = math.tanh %158 : vector<8x128xf32>
    %cst_62 = arith.constant 1.000000e+00 : f32
    %160 = vector.broadcast %cst_62 : f32 to vector<8x128xf32>
    %161 = arith.addf %159, %160 : vector<8x128xf32>
    %cst_63 = arith.constant 5.000000e-01 : f32
    %162 = vector.broadcast %cst_63 : f32 to vector<8x128xf32>
    %163 = arith.mulf %162, %161 : vector<8x128xf32>
    %164 = math.tanh %156 : vector<8x128xf32>
    %165 = vector.extract_strided_slice %163 {offsets = [0, 0], sizes = [8, 32], strides = [1, 1]} : vector<8x128xf32> to vector<8x32xf32>
    %166 = vector.extract_strided_slice %163 {offsets = [0, 32], sizes = [8, 32], strides = [1, 1]} : vector<8x128xf32> to vector<8x32xf32>
    %167 = vector.extract_strided_slice %164 {offsets = [0, 64], sizes = [8, 32], strides = [1, 1]} : vector<8x128xf32> to vector<8x32xf32>
    %168 = vector.extract_strided_slice %163 {offsets = [0, 96], sizes = [8, 32], strides = [1, 1]} : vector<8x128xf32> to vector<8x32xf32>
    %169 = arith.mulf %166, %150 : vector<8x32xf32>
    %170 = arith.mulf %165, %167 : vector<8x32xf32>
    %171 = arith.addf %169, %170 : vector<8x32xf32>
    %172 = math.tanh %171 : vector<8x32xf32>
    %173 = arith.mulf %168, %172 : vector<8x32xf32>
    %c56_64 = arith.constant 56 : index
    %c0_65 = arith.constant 0 : index
    %174 = vector.load %arg7[%c56_64, %c0_65] : memref<64x32xf32, #tpu.memory_space<vmem>>, vector<8x32xf32>
    tpu.vector_store %arg7[%c56_64, %c0_65], %173 {strides = array<i32>} : memref<64x32xf32, #tpu.memory_space<vmem>>, vector<8x32xf32>,
    %c0_66 = arith.constant 0 : index
    %c0_67 = arith.constant 0 : index
    %175 = vector.load %arg7[%c0_66, %c0_67] : memref<64x32xf32, #tpu.memory_space<vmem>>, vector<64x32xf32>
    %176 = arith.truncf %175 : vector<64x32xf32> to vector<64x32xbf16>
    %c0_68 = arith.constant 0 : index
    %c0_69 = arith.constant 0 : index
    %177 = vector.load %arg4[%c0_68, %c0_69] : memref<176x128xbf16, #tpu.memory_space<vmem>>, vector<32x128xbf16>
    %c32_70 = arith.constant 32 : index
    %c0_71 = arith.constant 0 : index
    %178 = vector.load %arg4[%c32_70, %c0_71] : memref<176x128xbf16, #tpu.memory_space<vmem>>, vector<1x128xbf16>
    %179 = arith.extf %178 : vector<1x128xbf16> to vector<1x128xf32>
    %c40_72 = arith.constant 40 : index
    %c0_73 = arith.constant 0 : index
    %180 = vector.load %arg4[%c40_72, %c0_73] : memref<176x128xbf16, #tpu.memory_space<vmem>>, vector<128x128xbf16>
    %c168 = arith.constant 168 : index
    %c0_74 = arith.constant 0 : index
    %181 = vector.load %arg4[%c168, %c0_74] : memref<176x128xbf16, #tpu.memory_space<vmem>>, vector<1x128xbf16>
    %182 = arith.extf %181 : vector<1x128xbf16> to vector<1x128xf32>
    %cst_75 = arith.constant dense<0.000000e+00> : vector<64x128xf32>
    %183 = tpu.matmul %176, %177, %cst_75 {dimension_numbers = #tpu.dot_dimension_numbers<[1], [0], [0], [1], [0, 0, 1, 1], [], []>} : vector<64x32xbf16>, vector<32x128xbf16>, vector<64x128xf32> -> vector<64x128xf32>
    %184 = vector.broadcast %179 : vector<1x128xf32> to vector<64x128xf32>
    %185 = arith.addf %183, %184 : vector<64x128xf32>
    %cst_76 = arith.constant 0.000000e+00 : f32
    %186 = vector.broadcast %cst_76 : f32 to vector<64x128xf32>
    %187 = arith.maximumf %185, %186 : vector<64x128xf32>
    %188 = arith.truncf %187 : vector<64x128xf32> to vector<64x128xbf16>
    %cst_77 = arith.constant dense<0.000000e+00> : vector<64x128xf32>
    %189 = tpu.matmul %188, %180, %cst_77 {dimension_numbers = #tpu.dot_dimension_numbers<[1], [0], [0], [1], [0, 0, 1, 1], [], []>} : vector<64x128xbf16>, vector<128x128xbf16>, vector<64x128xf32> -> vector<64x128xf32>
    %190 = vector.broadcast %182 : vector<1x128xf32> to vector<64x128xf32>
    %191 = arith.addf %189, %190 : vector<64x128xf32>
    %c0_78 = arith.constant 0 : index
    %c0_79 = arith.constant 0 : index
    %192 = vector.load %arg5[%c0_78, %c0_79] : memref<64x128xf32, #tpu.memory_space<vmem>>, vector<64x128xf32>
    tpu.vector_store %arg5[%c0_78, %c0_79], %191 {strides = array<i32>} : memref<64x128xf32, #tpu.memory_space<vmem>>, vector<64x128xf32>,
    return
  }
  func.func @transform_0(%arg0: i32) -> (i32, i32) {
    %c0_i32 = arith.constant 0 : i32
    %c0_i32_0 = arith.constant 0 : i32
    return %arg0, %c0_i32 : i32, i32
  }
  func.func @transform_1(%arg0: i32) -> (i32, i32) {
    %c0_i32 = arith.constant 0 : i32
    %c0_i32_0 = arith.constant 0 : i32
    %c0_i32_1 = arith.constant 0 : i32
    return %c0_i32, %c0_i32_0 : i32, i32
  }
  func.func @transform_2(%arg0: i32) -> (i32, i32) {
    %c0_i32 = arith.constant 0 : i32
    %c0_i32_0 = arith.constant 0 : i32
    %c0_i32_1 = arith.constant 0 : i32
    return %c0_i32, %c0_i32_0 : i32, i32
  }
  func.func @transform_3(%arg0: i32) -> (i32, i32) {
    %c0_i32 = arith.constant 0 : i32
    %c0_i32_0 = arith.constant 0 : i32
    %c0_i32_1 = arith.constant 0 : i32
    return %c0_i32, %c0_i32_0 : i32, i32
  }
  func.func @transform_4(%arg0: i32) -> (i32, i32) {
    %c0_i32 = arith.constant 0 : i32
    %c0_i32_0 = arith.constant 0 : i32
    return %arg0, %c0_i32 : i32, i32
  }
}

</mosaic_0001>

<bundles_post_ra>
// kernel: tpu_custom_call.1
= control target key start
LH: loop header
LB: loop body
LE: loop exit
PB: predicated region body
PF: predicated region fallthrough
CT: control target
= control target key end

     0   :  { %9 = vsyncpa [#allocation5], 0  ;;  %s1877_s0 = inlined_call_operand.vmem [shape: bf16[64,32], index: 0, kind: input, shape index: {}]   ;;  %s1878_s1 = inlined_call_operand.hbm [shape: bf16[32,128], index: 1, kind: input, shape index: {}]   ;;  %s1879_s2 = inlined_call_operand.vmem [shape: f32[40,128], index: 2, kind: input, shape index: {}]   ;;  %s1880_s3 = inlined_call_operand.hbm [shape: bf16[176,128], index: 3, kind: input, shape index: {}]   ;;  %s1881_s4 = inlined_call_operand.hbm [shape: f32[64,128], index: 4, kind: output, shape index: {}]  }
   0x1   :  { %10 = vsyncpa [#allocation8], 0 }
   0x2   :  { %11 = vsyncpa [#allocation6], 0  ;;  %s1610_s15 = smov [#allocation4]   ;;  %s1538_s19 = scalar_lea.hbm %s1878_s1, 256 }
   0x3   :  { %s19_s16 = sshll.u32 %s1610_s15, 4  ;;  %p1539_p0 = scmp.ne.s32.totalorder %s1878_s1, %s1538_s19  ;;  %s20_s16 = int_to_ptr.vmem [resolvable:$true] %s19_s16 }
   0x4   :  { %p1542_p1 = scmp.lt.u32.totalorder %s1538_s19, %s1878_s1 }
   0x6   :  { %p1544_p2 = pnand %p1542_p1, %p1539_p0 }
   0x8   :  { %1547 = shalt.err (!%p1544_p2)
}
   0x9   :  { %s1548_s24 = scalar_lea.vmem %s20_s16, 256  ;;  %p1553_p4 = scmp.lt.s32.totalorder %s20_s16, %s20_s16 }
   0xa   :  { %p1549_p3 = scmp.ne.s32.totalorder %s20_s16, %s1548_s24  ;;  %p1554_p5 = scmp.lt.s32.totalorder %s1548_s24, %s1548_s24 }
   0xc   :  { %p1555_p6 = por %p1554_p5, %p1553_p4 }
   0xe   :  { %p1556_p7 = pnand %p1555_p6, %p1549_p3 }
  0x10   :  { %1559 = shalt.err (!%p1556_p7)
}
  0x11   :  { %s1611_s25 = smov 64   ;;  %s1612_s26 = smov 4  }
  0x12   :  { %25 = dma.hbm_to_vmem [thread:$0]  %s1878_s1, 256, %s20_s16, [#allocation5], %s1611_s25, %s1611_s25, %s1612_s26  }
  0x13   :  { %s1613_s29 = smov [#allocation7]   ;;  %s1560_s7 = scalar_lea.hbm %s1880_s3, 1408 }
  0x14   :  { %s33_s30 = sshll.u32 %s1613_s29, 4  ;;  %p1561_p8 = scmp.ne.s32.totalorder %s1880_s3, %s1560_s7  ;;  %s34_s30 = int_to_ptr.vmem [resolvable:$true] %s33_s30 }
  0x15   :  { %p1564_p9 = scmp.lt.u32.totalorder %s1560_s7, %s1880_s3 }
  0x17   :  { %p1566_p10 = pnand %p1564_p9, %p1561_p8 }
  0x19   :  { %1569 = shalt.err (!%p1566_p10)
}
  0x1a   :  { %s1570_s12 = scalar_lea.vmem %s34_s30, 1408  ;;  %p1575_p12 = scmp.lt.s32.totalorder %s34_s30, %s34_s30 }
  0x1b   :  { %p1571_p11 = scmp.ne.s32.totalorder %s34_s30, %s1570_s12  ;;  %p1576_p13 = scmp.lt.s32.totalorder %s1570_s12, %s1570_s12 }
  0x1d   :  { %p1577_p0 = por %p1576_p13, %p1575_p12 }
  0x1f   :  { %p1578_p1 = pnand %p1577_p0, %p1571_p11 }
  0x21   :  { %1581 = shalt.err (!%p1578_p1)
}
  0x22   :  { %39 = dma.hbm_to_vmem [thread:$0]  %s1880_s3, 1408, %s34_s30, [#allocation8], %s1611_s25, %s1611_s25, %s1612_s26  }
  0x23   :  { %1604 = dma.done.wait [#allocation5], 256  }
  0x24   :  { %1605 = vsyncadd [#allocation5], 4294967040 }
  0x25   :  { %1606 = dma.done.wait [#allocation8], 1408  }
  0x26   :  { %1607 = vsyncadd [#allocation8], 4294965888  ;;  %v1474_v0 = vld [vmem:[#allocation4] sm:$0xff]   ;;  %v1475_v1 = vld [vmem:[#allocation4 + $0x8] sm:$0xff]   ;;  %vm96_vm0 = vcmask 261120   ;;  %s1614_s19 = smov 32  }
  0x27   :  { %1296 = vmatprep.subr.bf16.mxu1 %v1474_v0  ;;  %v1476_v2 = vld [vmem:[%s1877_s0] sm:$0xff]   ;;  %v1477_v3 = vld [vmem:[%s1877_s0 + $0x8] sm:$0xff]   ;;  %v1478_v22 = vld [vmem:[%s1877_s0 + $0x10] sm:$0xff]   ;;  %v1615_v23 = vmov 0.0|0.0   ;;  %vm1616_vm1 = vmmov 0   ;;  %v1617_v28 = vmov 0.0  }
  0x28   :  { %1297 = vmatpush3.bf16.msra.mxu1 %v1474_v0  ;;  %1300 = vmatprep.mubr.msk.bf16.mxu1 %vm96_vm0, %v1476_v2  ;;  %v1685_v4 = vld [vmem:[%s1879_s2 + $0x20] ss:$0 sm:$0xff]  ;;  %v183_v21 = vld [vmem:[%s1879_s2 + $0x8] sm:$0xff]  ;;  %v1479_v25 = vld [vmem:[%s1877_s0 + $0x18] sm:$0xff]   ;;  %s1618_s0 = smov [#allocation9]  }
  0x29   :  { %1298 = vmatprep.subr.bf16.mxu1 %v1475_v1  ;;  %v182_v20 = vld [vmem:[%s1879_s2] sm:$0xff]  ;;  %v184_v26 = vld [vmem:[%s1879_s2 + $0x10] sm:$0xff]  ;;  %v185_v27 = vld [vmem:[%s1879_s2 + $0x18] sm:$0xff]  ;;  %1433 = vmatprep.subr.bf16.mxu0 %v1615_v23  ;;  %s1192_s2 = sshll.u32 %s1618_s0, 4  ;;  %s1193_s2 = int_to_ptr.vmem [resolvable:$true] %s1192_s2 }
  0x2a   :  { %v1704_v24 = vpack.c.bf16 %v183_v21, %v182_v20  ;;  %1338 = vmatprep.mubr.msk.f32.mxu0 %vm1616_vm1, %v1617_v28  ;;  %v1720_v29 = vpack.c.bf16 %v185_v27, %v184_v26  ;;  %p1587_p3 = scmp.lt.s32.totalorder %s1193_s2, %s1193_s2 }
  0x2c   :  { %1299 = vmatpush3.bf16.msra.mxu1 %v1475_v1  ;;  %1435 = vmatpush3.bf16.msra.mxu0 %v1704_v24 }
  0x2d   :  { %1421 = vmatprep.subr.bf16.mxu1 %v1615_v23  ;;  %1436 = vmatprep.subr.bf16.mxu0 %v1615_v23 }
  0x2f   :  { %1301 = vmatmul.mubr.msk.bf16.vlgmr.msra.gmra.mrb[0].mxu1 %vm96_vm0, %v1477_v3 }
  0x30   :  { %1304 = vmatprep.mubr.msk.bf16.mxu1 %vm96_vm0, %v1478_v22  ;;  %1423 = vmatpush3.bf16.msra.mxu1 %v1704_v24 }
  0x31   :  { %1424 = vmatprep.subr.bf16.mxu1 %v1615_v23  ;;  %1438 = vmatpush3.bf16.msra.mxu0 %v1720_v29 }
  0x32   :  { %1445 = vmatprep.subr.bf16.mxu0 %v1615_v23 }
  0x34   :  { %1426 = vmatpush3.bf16.msra.mxu1 %v1720_v29 }
  0x35   :  { %1427 = vmatprep.subr.bf16.mxu1 %v1615_v23 }
  0x37   :  { %1305 = vmatmul.mubr.msk.bf16.gmra.mrb[4].mxu1 %vm96_vm0, %v1479_v25 }
  0x38   :  { %1316 = vmatprep.mubr.msk.f32.mxu1 %vm1616_vm1, %v1617_v28 }
 0x102   :  { %v1687_v5 = vpop.f32.mrb[0].mxu1 }
 0x103   :  { %v143_v6 = vpop.f32.mrb[1].mxu1  ;;  %v152_v56 = vadd.f32 %v1687_v5, %v1685_v4 }
 0x104   :  { %v144_v7 = vadd.f32 %v1685_v4, %v143_v6  ;;  %v1690_v8 = vpop.f32.mrb[2].mxu1 }
 0x105   :  { %v146_v9 = vpop.f32.mrb[3].mxu1 }
 0x106   :  { %1490 = vtanh.f32 %v144_v7  ;;  %v187_v11 = vmul.f32 0.5, %v144_v7  ;;  %v147_v38 = vadd.f32 %v1685_v4, %v146_v9 }
 0x108   :  { %1492 = vtanh.f32 %v187_v11 }
 0x10a   :  { %v1734_v33 = vpop.f32.mrb[4].mxu1 }
 0x10b   :  { %v1736_v34 = vpop.f32.mrb[5].mxu1 }
 0x10c   :  { %v1738_v35 = vpop.f32.mrb[6].mxu1 }
 0x10d   :  { %v1740_v36 = vpop.f32.mrb[7].mxu1 }
 0x110   :  { %v1491_v10 = vpop.eup %1490 }
 0x111   :  { %194 = vrot.lane.b32.xlu0 %v1491_v10, %s1611_s25 }
 0x112   :  { %v1493_v12 = vpop.eup %1492 }
 0x113   :  { %v189_v13 = vadd.f32 1.0, %v1493_v12  ;;  %v155_v12 = vadd.f32 %v1690_v8, %v1685_v4 }
 0x115   :  { %v190_v14 = vmul.f32 0.5, %v189_v13 }
 0x117   :  { %v192_v17 = vmul.f32 0.0, %v190_v14 }
 0x183   :  { %v195_v15 = vpop.permute.xlu0 %194 }
 0x184   :  { %v197_v16 = vmul.f32 %v195_v15, %v190_v14 }
 0x186   :  { %199 = vrot.lane.b32.xlu0 %v197_v16, %s1614_s19 }
 0x1f8   :  { %v200_v18 = vpop.permute.xlu0 %199 }
 0x1f9   :  { %v202_v19 = vadd.f32 %v200_v18, %v192_v17 }
 0x1fb   :  { %1494 = vtanh.f32 %v202_v19 }
 0x205   :  { %v1495_v30 = vpop.eup %1494 }
 0x206   :  { %205 = vrot.lane.b32.xlu1 %v1495_v30, %s1611_s25 }
 0x278   :  { %v206_v31 = vpop.permute.xlu1 %205 }
 0x279   :  { %v208_v32 = vmul.f32 %v206_v31, %v190_v14 }
 0x27b   :  { %210 = vrot.lane.b32.xlu1 %v208_v32, %s1614_s19 }
 0x2ed   :  { %v211_v37 = vpop.permute.xlu1 %210 }
 0x2ee   :  { %213 = vst.msk [vmem:[#allocation3] sm:$0xff] %vm96_vm0, %v211_v37  ;;  %1317 = vmatmul.mubr.msk.f32.vlgmr.msra.gmra.mrb[8].mxu1 %vm96_vm0, %v211_v37  ;;  %v160_v37 = vadd.f32 %v1685_v4, %v1736_v34 }
 0x2ef   :  { %1429 = vmatpush3.bf16.msra.mxu1 %v1704_v24  ;;  %1327 = vmatprep.mubr.msk.f32.mxu1 %vm1616_vm1, %v1617_v28 }
 0x2f0   :  { %1430 = vmatprep.subr.bf16.mxu1 %v1615_v23 }
 0x2f3   :  { %1432 = vmatpush3.bf16.msra.mxu1 %v1720_v29 }
 0x2f4   :  { %1439 = vmatprep.subr.bf16.mxu1 %v1615_v23 }
 0x3c1   :  { %v283_v39 = vpop.f32.mrb[8].mxu1 }
 0x3c2   :  { %v287_v40 = vadd.f32 %v283_v39, %v147_v38  ;;  %v1318_v41 = vpop.f32.mrb[9].mxu1 }
 0x3c4   :  { %1496 = vtanh.f32 %v287_v40  ;;  %v288_v43 = vmul.f32 0.5, %v287_v40 }
 0x3c6   :  { %1498 = vtanh.f32 %v288_v43 }
 0x3ce   :  { %v1497_v42 = vpop.eup %1496 }
 0x3cf   :  { %295 = vrot.lane.b32.xlu0 %v1497_v42, %s1611_s25 }
 0x3d0   :  { %v1499_v44 = vpop.eup %1498 }
 0x3d1   :  { %v290_v45 = vadd.f32 1.0, %v1499_v44 }
 0x3d3   :  { %v291_v46 = vmul.f32 0.5, %v290_v45 }
 0x3d5   :  { %v293_v49 = vmul.f32 %v291_v46, %v202_v19 }
 0x441   :  { %v296_v47 = vpop.permute.xlu0 %295 }
 0x442   :  { %v298_v48 = vmul.f32 %v296_v47, %v291_v46 }
 0x444   :  { %300 = vrot.lane.b32.xlu1 %v298_v48, %s1614_s19 }
 0x4b6   :  { %v301_v50 = vpop.permute.xlu1 %300 }
 0x4b7   :  { %v303_v51 = vadd.f32 %v301_v50, %v293_v49 }
 0x4b9   :  { %1500 = vtanh.f32 %v303_v51 }
 0x4c3   :  { %v1501_v52 = vpop.eup %1500 }
 0x4c4   :  { %306 = vrot.lane.b32.xlu0 %v1501_v52, %s1611_s25 }
 0x536   :  { %v307_v53 = vpop.permute.xlu0 %306 }
 0x537   :  { %v309_v54 = vmul.f32 %v307_v53, %v291_v46 }
 0x539   :  { %311 = vrot.lane.b32.xlu1 %v309_v54, %s1614_s19  ;;  %v163_v54 = vadd.f32 %v1685_v4, %v1740_v36  ;;  %v1480_v36 = vld [vmem:[#allocation7] sm:$0xff]  }
 0x5ab   :  { %v312_v55 = vpop.permute.xlu1 %311 }
 0x5ac   :  { %314 = vst.msk [vmem:[#allocation3 + $0x8] sm:$0xff] %vm96_vm0, %v312_v55  ;;  %1328 = vmatmul.mubr.msk.f32.vlgmr.msra.gmra.mrb[10].mxu1 %vm96_vm0, %v312_v55 }
 0x5ad   :  { %1441 = vmatpush3.bf16.msra.mxu1 %v1704_v24  ;;  %1349 = vmatprep.mubr.msk.f32.mxu1 %vm1616_vm1, %v1617_v28 }
 0x5ae   :  { %1442 = vmatprep.subr.bf16.mxu1 %v1615_v23 }
 0x5b1   :  { %1444 = vmatpush3.bf16.msra.mxu1 %v1720_v29 }
 0x5b2   :  { %1451 = vmatprep.subr.bf16.mxu1 %v1615_v23 }
 0x67f   :  { %v384_v57 = vpop.f32.mrb[10].mxu1 }
 0x680   :  { %v388_v58 = vadd.f32 %v384_v57, %v152_v56  ;;  %v1329_v59 = vpop.f32.mrb[11].mxu1 }
 0x682   :  { %1502 = vtanh.f32 %v388_v58  ;;  %v389_v61 = vmul.f32 0.5, %v388_v58 }
 0x684   :  { %1504 = vtanh.f32 %v389_v61 }
 0x68c   :  { %v1503_v60 = vpop.eup %1502 }
 0x68d   :  { %396 = vrot.lane.b32.xlu0 %v1503_v60, %s1611_s25 }
 0x68e   :  { %v1505_v62 = vpop.eup %1504 }
 0x68f   :  { %v391_v63 = vadd.f32 1.0, %v1505_v62 }
 0x691   :  { %v392_v0 = vmul.f32 0.5, %v391_v63 }
 0x693   :  { %v394_v3 = vmul.f32 %v392_v0, %v303_v51 }
 0x6ff   :  { %v397_v1 = vpop.permute.xlu0 %396 }
 0x700   :  { %v399_v2 = vmul.f32 %v397_v1, %v392_v0 }
 0x702   :  { %401 = vrot.lane.b32.xlu1 %v399_v2, %s1614_s19 }
 0x774   :  { %v402_v6 = vpop.permute.xlu1 %401 }
 0x775   :  { %v404_v7 = vadd.f32 %v402_v6, %v394_v3  ;;  %v922_v3 = vld [vmem:[#allocation3 + $0x8] sm:$0xff]  ;;  %v921_v6 = vld [vmem:[#allocation3] sm:$0xff] }
 0x777   :  { %1506 = vtanh.f32 %v404_v7 }
 0x781   :  { %v1507_v5 = vpop.eup %1506 }
 0x782   :  { %407 = vrot.lane.b32.xlu0 %v1507_v5, %s1611_s25 }
 0x7f4   :  { %v408_v9 = vpop.permute.xlu0 %407 }
 0x7f5   :  { %v410_v10 = vmul.f32 %v408_v9, %v392_v0  ;;  %v929_v9 = vpack.c.bf16 %v922_v3, %v921_v6  ;;  %v955_v3 = vld [vmem:[#allocation7 + $0x54] sm:$0x1] }
 0x7f6   :  { %v956_v6 = vunpack.c.l.bf16 %v955_v3 }
 0x7f7   :  { %412 = vrot.lane.b32.xlu1 %v410_v10, %s1614_s19 }
 0x869   :  { %v413_v11 = vpop.permute.xlu1 %412 }
 0x86a   :  { %415 = vst.msk [vmem:[#allocation3 + $0x10] sm:$0xff] %vm96_vm0, %v413_v11  ;;  %1339 = vmatmul.mubr.msk.f32.vlgmr.msra.gmra.mrb[0].mxu0 %vm96_vm0, %v413_v11 }
 0x86b   :  { %1447 = vmatpush3.bf16.msra.mxu0 %v1704_v24  ;;  %1360 = vmatprep.mubr.msk.f32.mxu0 %vm1616_vm1, %v1617_v28 }
 0x86c   :  { %1448 = vmatprep.subr.bf16.mxu0 %v1615_v23 }
 0x86f   :  { %1450 = vmatpush3.bf16.msra.mxu0 %v1720_v29 }
 0x870   :  { %1457 = vmatprep.subr.bf16.mxu0 %v1615_v23 }
 0x871   :  { %v923_v11 = vld [vmem:[#allocation3 + $0x10] sm:$0xff] }
 0x93d   :  { %v485_v13 = vpop.f32.mrb[0].mxu0 }
 0x93e   :  { %v489_v14 = vadd.f32 %v485_v13, %v155_v12  ;;  %v1340_v15 = vpop.f32.mrb[1].mxu0 }
 0x940   :  { %1508 = vtanh.f32 %v489_v14  ;;  %v490_v17 = vmul.f32 0.5, %v489_v14 }
 0x942   :  { %1510 = vtanh.f32 %v490_v17 }
 0x94a   :  { %v1509_v16 = vpop.eup %1508 }
 0x94b   :  { %497 = vrot.lane.b32.xlu0 %v1509_v16, %s1611_s25  ;;  %v957_v16 = vlaneseq }
 0x94c   :  { %v1511_v18 = vpop.eup %1510 }
 0x94d   :  { %v492_v19 = vadd.f32 1.0, %v1511_v18  ;;  %v1817_v17 = vshrl.u32 %v957_v16, 7  ;;  %v937_v18 = vld [vmem:[#allocation7 + $0x10] sm:$0x1] }
 0x94f   :  { %v493_v20 = vmul.f32 0.5, %v492_v19  ;;  %v168_v19 = vadd.f32 %v1734_v33, %v1685_v4 }
 0x951   :  { %v495_v25 = vmul.f32 %v493_v20, %v404_v7  ;;  %v1481_v7 = vld [vmem:[#allocation7 + $0x8] sm:$0xff]  }
 0x9bd   :  { %v498_v21 = vpop.permute.xlu0 %497 }
 0x9be   :  { %v500_v22 = vmul.f32 %v498_v21, %v493_v20 }
 0x9c0   :  { %502 = vrot.lane.b32.xlu1 %v500_v22, %s1614_s19 }
 0xa32   :  { %v503_v26 = vpop.permute.xlu1 %502 }
 0xa33   :  { %v505_v27 = vadd.f32 %v503_v26, %v495_v25  ;;  %v938_v25 = vunpack.c.l.bf16 %v937_v18  ;;  %v959_v26 = vsub.s32 0, %v1817_v17 }
 0xa35   :  { %1512 = vtanh.f32 %v505_v27 }
 0xa3f   :  { %v1513_v8 = vpop.eup %1512 }
 0xa40   :  { %508 = vrot.lane.b32.xlu0 %v1513_v8, %s1611_s25 }
 0xab2   :  { %v509_v30 = vpop.permute.xlu0 %508 }
 0xab3   :  { %v511_v31 = vmul.f32 %v509_v30, %v493_v20 }
 0xab5   :  { %513 = vrot.lane.b32.xlu1 %v511_v31, %s1614_s19 }
 0xb27   :  { %v514_v32 = vpop.permute.xlu1 %513 }
 0xb28   :  { %516 = vst.msk [vmem:[#allocation3 + $0x18] sm:$0xff] %vm96_vm0, %v514_v32  ;;  %1350 = vmatmul.mubr.msk.f32.vlgmr.msra.gmra.mrb[12].mxu1 %vm96_vm0, %v514_v32 }
 0xb29   :  { %1453 = vmatpush3.bf16.msra.mxu1 %v1704_v24  ;;  %1371 = vmatprep.mubr.msk.f32.mxu1 %vm1616_vm1, %v1617_v28 }
 0xb2a   :  { %1454 = vmatprep.subr.bf16.mxu1 %v1615_v23 }
 0xb2d   :  { %1456 = vmatpush3.bf16.msra.mxu1 %v1720_v29 }
 0xb2e   :  { %1385 = vmatprep.subr.bf16.mxu1 %v1480_v36 }
 0xb2f   :  { %v924_v10 = vld [vmem:[#allocation3 + $0x18] sm:$0xff] }
 0xb30   :  { %v930_v12 = vpack.c.bf16 %v924_v10, %v923_v11 }
 0xbfb   :  { %v586_v38 = vpop.f32.mrb[12].mxu1 }
 0xbfc   :  { %v590_v39 = vadd.f32 %v586_v38, %v160_v37  ;;  %v1351_v40 = vpop.f32.mrb[13].mxu1 }
 0xbfe   :  { %1514 = vtanh.f32 %v590_v39  ;;  %v591_v42 = vmul.f32 0.5, %v590_v39 }
 0xc00   :  { %1516 = vtanh.f32 %v591_v42 }
 0xc08   :  { %v1515_v41 = vpop.eup %1514 }
 0xc09   :  { %598 = vrot.lane.b32.xlu0 %v1515_v41, %s1611_s25 }
 0xc0a   :  { %v1517_v43 = vpop.eup %1516 }
 0xc0b   :  { %v593_v44 = vadd.f32 1.0, %v1517_v43 }
 0xc0d   :  { %v594_v45 = vmul.f32 0.5, %v593_v44 }
 0xc0f   :  { %v596_v48 = vmul.f32 %v594_v45, %v505_v27  ;;  %v1824_v27 = vrot.slane %v938_v25, %v959_v26 }
 0xc7b   :  { %v599_v46 = vpop.permute.xlu0 %598 }
 0xc7c   :  { %v601_v47 = vmul.f32 %v599_v46, %v594_v45 }
 0xc7e   :  { %603 = vrot.lane.b32.xlu1 %v601_v47, %s1614_s19 }
 0xcf0   :  { %v604_v49 = vpop.permute.xlu1 %603 }
 0xcf1   :  { %v606_v50 = vadd.f32 %v604_v49, %v596_v48 }
 0xcf3   :  { %1518 = vtanh.f32 %v606_v50 }
 0xcfd   :  { %v1519_v34 = vpop.eup %1518 }
 0xcfe   :  { %609 = vrot.lane.b32.xlu0 %v1519_v34, %s1611_s25 }
 0xd70   :  { %v610_v51 = vpop.permute.xlu0 %609 }
 0xd71   :  { %v612_v52 = vmul.f32 %v610_v51, %v594_v45 }
 0xd73   :  { %614 = vrot.lane.b32.xlu1 %v612_v52, %s1614_s19 }
 0xde5   :  { %v615_v53 = vpop.permute.xlu1 %614 }
 0xde6   :  { %617 = vst.msk [vmem:[#allocation3 + $0x20] sm:$0xff] %vm96_vm0, %v615_v53  ;;  %1361 = vmatmul.mubr.msk.f32.vlgmr.msra.gmra.mrb[2].mxu0 %vm96_vm0, %v615_v53 }
 0xde7   :  { %1459 = vmatpush3.bf16.msra.mxu0 %v1704_v24  ;;  %1382 = vmatprep.mubr.msk.f32.mxu0 %vm1616_vm1, %v1617_v28 }
 0xde8   :  { %1460 = vmatprep.subr.bf16.mxu0 %v1615_v23 }
 0xdeb   :  { %1462 = vmatpush3.bf16.msra.mxu0 %v1720_v29 }
 0xded   :  { %v925_v13 = vld [vmem:[#allocation3 + $0x20] sm:$0xff] }
 0xeb9   :  { %v687_v55 = vpop.f32.mrb[2].mxu0 }
 0xeba   :  { %v691_v56 = vadd.f32 %v687_v55, %v163_v54  ;;  %v1362_v57 = vpop.f32.mrb[3].mxu0  ;;  %v1482_v55 = vld [vmem:[#allocation7 + $0x14] sm:$0xff]  }
 0xebb   :  { %1397 = vmatprep.subr.bf16.mxu0 %v1482_v55 }
 0xebc   :  { %1520 = vtanh.f32 %v691_v56  ;;  %v692_v59 = vmul.f32 0.5, %v691_v56 }
 0xebe   :  { %1522 = vtanh.f32 %v692_v59  ;;  %v1483_v59 = vld [vmem:[#allocation7 + $0x1c] sm:$0xff]  }
 0xec6   :  { %v1521_v58 = vpop.eup %1520 }
 0xec7   :  { %699 = vrot.lane.b32.xlu0 %v1521_v58, %s1611_s25 }
 0xec8   :  { %v1523_v24 = vpop.eup %1522 }
 0xec9   :  { %v694_v60 = vadd.f32 1.0, %v1523_v24 }
 0xecb   :  { %v695_v61 = vmul.f32 0.5, %v694_v60  ;;  %v1484_v60 = vld [vmem:[#allocation7 + $0x24] sm:$0xff]  }
 0xecd   :  { %v697_v23 = vmul.f32 %v695_v61, %v606_v50 }
 0xf39   :  { %v700_v28 = vpop.permute.xlu0 %699 }
 0xf3a   :  { %v702_v62 = vmul.f32 %v700_v28, %v695_v61  ;;  %v1486_v28 = vld [vmem:[#allocation7 + $0x34] sm:$0xff]  }
 0xf3c   :  { %704 = vrot.lane.b32.xlu1 %v702_v62, %s1614_s19  ;;  %v1487_v62 = vld [vmem:[#allocation7 + $0x3c] sm:$0xff]  }
 0xfae   :  { %v705_v29 = vpop.permute.xlu1 %704 }
 0xfaf   :  { %v1807_v63 = vadd.f32 %v705_v29, %v697_v23  ;;  %v1488_v23 = vld [vmem:[#allocation7 + $0x44] sm:$0xff]   ;;  %v1489_v29 = vld [vmem:[#allocation7 + $0x4c] sm:$0xff]  }
 0xfb1   :  { %1524 = vtanh.f32 %v1807_v63 }
 0xfbb   :  { %v1525_v0 = vpop.eup %1524 }
 0xfbc   :  { %710 = vrot.lane.b32.xlu0 %v1525_v0, %s1611_s25 }
0x102e   :  { %v711_v1 = vpop.permute.xlu0 %710 }
0x102f   :  { %v713_v2 = vmul.f32 %v711_v1, %v695_v61  ;;  %v1485_v61 = vld [vmem:[#allocation7 + $0x2c] sm:$0xff]  }
0x1031   :  { %715 = vrot.lane.b32.xlu1 %v713_v2, %s1614_s19 }
0x10a3   :  { %v716_v5 = vpop.permute.xlu1 %715 }
0x10a4   :  { %718 = vst.msk [vmem:[#allocation3 + $0x28] sm:$0xff] %vm96_vm0, %v716_v5  ;;  %1372 = vmatmul.mubr.msk.f32.vlgmr.msra.gmra.mrb[14].mxu1 %vm96_vm0, %v716_v5 }
0x10a5   :  { %1386 = vmatpush3.bf16.msra.mxu1 %v1480_v36  ;;  %1389 = vmatprep.mubr.msk.bf16.mxu1 %vm96_vm0, %v929_v9 }
0x10a6   :  { %1387 = vmatprep.subr.bf16.mxu1 %v1481_v7 }
0x10a9   :  { %1388 = vmatpush3.bf16.msra.mxu1 %v1481_v7  ;;  %v1845_v7 = vrot.slane %v956_v6, %v959_v26 }
0x10ab   :  { %v926_v14 = vld [vmem:[#allocation3 + $0x28] sm:$0xff] }
0x10ac   :  { %1390 = vmatmul.mubr.msk.bf16.vlgmr.msra.gmra.mrb[16].mxu1 %vm96_vm0, %v930_v12  ;;  %v931_v15 = vpack.c.bf16 %v926_v14, %v925_v13 }
0x10ae   :  { %1393 = vmatprep.mubr.msk.bf16.mxu1 %vm96_vm0, %v931_v15 }
0x1177   :  { %v788_v20 = vpop.f32.mrb[14].mxu1 }
0x1178   :  { %v792_v21 = vadd.f32 %v788_v20, %v168_v19  ;;  %v1373_v22 = vpop.f32.mrb[15].mxu1 }
0x117a   :  { %1526 = vtanh.f32 %v792_v21  ;;  %v793_v47 = vmul.f32 0.5, %v792_v21 }
0x117c   :  { %1528 = vtanh.f32 %v793_v47 }
0x117f   :  { %v1391_v8 = vpop.f32.mrb[16].mxu1 }
0x1180   :  { %v1028_v30 = vadd.f32 %v1391_v8, %v1824_v27  ;;  %v1019_v31 = vpop.f32.mrb[17].mxu1 }
0x1181   :  { %v1020_v32 = vadd.f32 %v1019_v31, %v1824_v27  ;;  %v1392_v37 = vpop.f32.mrb[18].mxu1 }
0x1182   :  { %v1031_v33 = vadd.f32 %v1392_v37, %v1824_v27  ;;  %v1022_v38 = vpop.f32.mrb[19].mxu1  ;;  %v1052_v41 = vmax.f32 %v1028_v30, 0.0 }
0x1183   :  { %v1023_v39 = vadd.f32 %v1022_v38, %v1824_v27  ;;  %v1050_v43 = vmax.f32 %v1020_v32, 0.0 }
0x1184   :  { %v1527_v40 = vpop.eup %1526  ;;  %v1053_v42 = vmax.f32 %v1031_v33, 0.0 }
0x1185   :  { %v1051_v44 = vmax.f32 %v1023_v39, 0.0  ;;  %800 = vrot.lane.b32.xlu0 %v1527_v40, %s1611_s25 }
0x1186   :  { %v1059_v45 = vpack.c.bf16 %v1053_v42, %v1052_v41  ;;  %v1529_v48 = vpop.eup %1528 }
0x1187   :  { %v1058_v46 = vpack.c.bf16 %v1051_v44, %v1050_v43  ;;  %v795_v49 = vadd.f32 1.0, %v1529_v48 }
0x1189   :  { %v796_v50 = vmul.f32 0.5, %v795_v49 }
0x118b   :  { %v798_v52 = vmul.f32 %v796_v50, %v1807_v63  ;;  %v171_v63 = vadd.f32 %v1738_v35, %v1685_v4 }
0x11f7   :  { %v801_v34 = vpop.permute.xlu0 %800 }
0x11f8   :  { %v803_v51 = vmul.f32 %v801_v34, %v796_v50 }
0x11fa   :  { %805 = vrot.lane.b32.xlu1 %v803_v51, %s1614_s19 }
0x126c   :  { %v806_v53 = vpop.permute.xlu1 %805 }
0x126d   :  { %v1833_v54 = vadd.f32 %v806_v53, %v798_v52 }
0x126f   :  { %1530 = vtanh.f32 %v1833_v54 }
0x1279   :  { %v1531_v56 = vpop.eup %1530 }
0x127a   :  { %811 = vrot.lane.b32.xlu0 %v1531_v56, %s1611_s25 }
0x12ec   :  { %v812_v57 = vpop.permute.xlu0 %811 }
0x12ed   :  { %v814_v58 = vmul.f32 %v812_v57, %v796_v50 }
0x12ef   :  { %816 = vrot.lane.b32.xlu1 %v814_v58, %s1614_s19 }
0x1361   :  { %v817_v24 = vpop.permute.xlu1 %816 }
0x1362   :  { %819 = vst.msk [vmem:[#allocation3 + $0x30] sm:$0xff] %vm96_vm0, %v817_v24  ;;  %1383 = vmatmul.mubr.msk.f32.vlgmr.msra.gmra.mrb[4].mxu0 %vm96_vm0, %v817_v24 }
0x1363   :  { %1398 = vmatpush3.bf16.msra.mxu0 %v1482_v55  ;;  %1413 = vmatprep.mubr.bf16.mxu0 %v1058_v46 }
0x1364   :  { %1399 = vmatprep.subr.bf16.mxu0 %v1483_v59 }
0x1367   :  { %1400 = vmatpush3.bf16.msra.mxu0 %v1483_v59 }
0x1368   :  { %1401 = vmatprep.subr.bf16.mxu0 %v1484_v60 }
0x1369   :  { %v927_v31 = vld [vmem:[#allocation3 + $0x30] sm:$0xff] }
0x136b   :  { %1402 = vmatpush3.bf16.msra.mxu0 %v1484_v60 }
0x136c   :  { %1403 = vmatprep.subr.bf16.mxu0 %v1485_v61 }
0x136f   :  { %1404 = vmatpush3.bf16.msra.mxu0 %v1485_v61 }
0x1370   :  { %1405 = vmatprep.subr.bf16.mxu0 %v1486_v28 }
0x1373   :  { %1406 = vmatpush3.bf16.msra.mxu0 %v1486_v28 }
0x1374   :  { %1407 = vmatprep.subr.bf16.mxu0 %v1487_v62 }
0x1377   :  { %1408 = vmatpush3.bf16.msra.mxu0 %v1487_v62 }
0x1378   :  { %1409 = vmatprep.subr.bf16.mxu0 %v1488_v23 }
0x137b   :  { %1410 = vmatpush3.bf16.msra.mxu0 %v1488_v23 }
0x137c   :  { %1411 = vmatprep.subr.bf16.mxu0 %v1489_v29 }
0x137f   :  { %1412 = vmatpush3.bf16.msra.mxu0 %v1489_v29 }
0x1382   :  { %1414 = vmatmul.mubr.bf16.vlgmr.msra.gmra.mrb[8].mxu0 %v1059_v45 }
0x1435   :  { %v889_v36 = vpop.f32.mrb[4].mxu0 }
0x1436   :  { %v893_v0 = vadd.f32 %v889_v36, %v171_v63  ;;  %v1384_v1 = vpop.f32.mrb[5].mxu0 }
0x1438   :  { %1532 = vtanh.f32 %v893_v0  ;;  %v894_v14 = vmul.f32 0.5, %v893_v0 }
0x143a   :  { %1534 = vtanh.f32 %v894_v14 }
0x1442   :  { %v1533_v2 = vpop.eup %1532 }
0x1443   :  { %901 = vrot.lane.b32.xlu0 %v1533_v2, %s1611_s25 }
0x1444   :  { %v1535_v15 = vpop.eup %1534 }
0x1445   :  { %v896_v16 = vadd.f32 1.0, %v1535_v15 }
0x1447   :  { %v897_v17 = vmul.f32 0.5, %v896_v16 }
0x1449   :  { %v899_v20 = vmul.f32 %v897_v17, %v1833_v54 }
0x1455   :  { %v1415_v5 = vpop.f32.mrb[8].mxu0 }
0x1456   :  { %v1157_v9 = vadd.f32 %v1415_v5, %v1845_v7  ;;  %v1148_v10 = vpop.f32.mrb[9].mxu0 }
0x1457   :  { %v1149_v11 = vadd.f32 %v1148_v10, %v1845_v7  ;;  %v1416_v4 = vpop.f32.mrb[10].mxu0 }
0x1458   :  { %1181 = vst [vmem:[#allocation9 + $0x10] sm:$0xff] %v1157_v9  ;;  %v1160_v35 = vadd.f32 %v1416_v4, %v1845_v7  ;;  %v1151_v12 = vpop.f32.mrb[11].mxu0 }
0x1459   :  { %1179 = vst [vmem:[#allocation9] sm:$0xff] %v1149_v11  ;;  %v1152_v13 = vadd.f32 %v1151_v12, %v1845_v7 }
0x145a   :  { %1182 = vst [vmem:[#allocation9 + $0x18] sm:$0xff] %v1160_v35 }
0x145b   :  { %1180 = vst [vmem:[#allocation9 + $0x8] sm:$0xff] %v1152_v13 }
0x14b5   :  { %v902_v18 = vpop.permute.xlu0 %901 }
0x14b6   :  { %v904_v19 = vmul.f32 %v902_v18, %v897_v17 }
0x14b8   :  { %906 = vrot.lane.b32.xlu1 %v904_v19, %s1614_s19 }
0x152a   :  { %v907_v21 = vpop.permute.xlu1 %906 }
0x152b   :  { %v909_v22 = vadd.f32 %v907_v21, %v899_v20 }
0x152d   :  { %1536 = vtanh.f32 %v909_v22 }
0x1537   :  { %v1537_v25 = vpop.eup %1536 }
0x1538   :  { %912 = vrot.lane.b32.xlu0 %v1537_v25, %s1611_s25  ;;  %s1582_s25 = scalar_lea.vmem %s1193_s2, 1024 }
0x1539   :  { %p1583_p2 = scmp.ne.s32.totalorder %s1193_s2, %s1582_s25  ;;  %p1588_p4 = scmp.lt.s32.totalorder %s1582_s25, %s1582_s25 }
0x153b   :  { %p1589_p5 = por %p1588_p4, %p1587_p3 }
0x153d   :  { %p1590_p6 = pnand %p1589_p5, %p1583_p2 }
0x15aa   :  { %v913_v26 = vpop.permute.xlu0 %912 }
0x15ab   :  { %v915_v8 = vmul.f32 %v913_v26, %v897_v17 }
0x15ad   :  { %917 = vrot.lane.b32.xlu1 %v915_v8, %s1614_s19 }
0x161f   :  { %v918_v30 = vpop.permute.xlu1 %917 }
0x1620   :  { %920 = vst.msk [vmem:[#allocation3 + $0x38] sm:$0xff] %vm96_vm0, %v918_v30 }
0x1627   :  { %v928_v32 = vld [vmem:[#allocation3 + $0x38] sm:$0xff] }
0x1628   :  { %v932_v37 = vpack.c.bf16 %v928_v32, %v927_v31 }
0x162a   :  { %1394 = vmatmul.mubr.msk.bf16.gmra.mrb[20].mxu1 %vm96_vm0, %v932_v37 }
0x16fd   :  { %v1395_v33 = vpop.f32.mrb[20].mxu1 }
0x16fe   :  { %v1044_v38 = vadd.f32 %v1395_v33, %v1824_v27  ;;  %v1035_v39 = vpop.f32.mrb[21].mxu1 }
0x16ff   :  { %v1036_v40 = vadd.f32 %v1035_v39, %v1824_v27  ;;  %v1396_v41 = vpop.f32.mrb[22].mxu1 }
0x1700   :  { %v1047_v42 = vadd.f32 %v1396_v41, %v1824_v27  ;;  %v1038_v43 = vpop.f32.mrb[23].mxu1  ;;  %v1056_v45 = vmax.f32 %v1044_v38, 0.0 }
0x1701   :  { %v1039_v44 = vadd.f32 %v1038_v43, %v1824_v27  ;;  %v1054_v47 = vmax.f32 %v1036_v40, 0.0 }
0x1702   :  { %v1057_v46 = vmax.f32 %v1047_v42, 0.0 }
0x1703   :  { %v1055_v48 = vmax.f32 %v1039_v44, 0.0 }
0x1704   :  { %v1061_v49 = vpack.c.bf16 %v1057_v46, %v1056_v45 }
0x1705   :  { %v1060_v50 = vpack.c.bf16 %v1055_v48, %v1054_v47 }
0x1707   :  { %1417 = vmatprep.mubr.bf16.mxu0 %v1060_v50 }
0x1708   :  { %1418 = vmatmul.mubr.bf16.gmra.mrb[12].mxu0 %v1061_v49 }
0x17db   :  { %v1419_v34 = vpop.f32.mrb[12].mxu0 }
0x17dc   :  { %v1173_v51 = vadd.f32 %v1419_v34, %v1845_v7  ;;  %v1164_v52 = vpop.f32.mrb[13].mxu0 }
0x17dd   :  { %v1165_v53 = vadd.f32 %v1164_v52, %v1845_v7  ;;  %v1420_v54 = vpop.f32.mrb[14].mxu0 }
0x17de   :  { %1185 = vst [vmem:[#allocation9 + $0x30] sm:$0xff] %v1173_v51  ;;  %v1176_v27 = vadd.f32 %v1420_v54, %v1845_v7  ;;  %v1167_v55 = vpop.f32.mrb[15].mxu0 }
0x17df   :  { %1183 = vst [vmem:[#allocation9 + $0x20] sm:$0xff] %v1165_v53  ;;  %v1168_v56 = vadd.f32 %v1167_v55, %v1845_v7 }
0x17e0   :  { %1186 = vst [vmem:[#allocation9 + $0x38] sm:$0xff] %v1176_v27 }
0x17e1   :  { %1184 = vst [vmem:[#allocation9 + $0x28] sm:$0xff] %v1168_v56 }
0x17e2   :  { %1593 = shalt.err (!%p1590_p6)
}
0x17e3   :  { %s1594_s9 = scalar_lea.hbm %s1881_s4, 1024 }
0x17e4   :  { %p1595_p7 = scmp.ne.s32.totalorder %s1881_s4, %s1594_s9  ;;  %p1598_p8 = scmp.lt.u32.totalorder %s1594_s9, %s1881_s4 }
0x17e6   :  { %p1600_p9 = pnand %p1598_p8, %p1595_p7 }
0x17e8   :  { %1603 = shalt.err (!%p1600_p9)
}
0x17e9   :  { %s1619_s13 = smov 128   ;;  %s1620_s14 = smov 8  }
0x17ea   :  { %1198 = dma.vmem_to_hbm [thread:$0]  %s1193_s2, 1024, %s1881_s4, [#allocation6], %s1619_s13, %s1619_s13, %s1620_s14  }
0x17eb   :  { %1608 = dma.done.wait [#allocation6], 1024  }
0x17ec   :  { %1609 = vsyncadd [#allocation6], 4294966272 }
0x17ed   :  { %1202 = vsyncpa [#allocation5], 1 }
0x17ee   :  { %1203 = vsyncpa [#allocation8], 1 }
0x17ef   :  { %1204 = vsyncpa [#allocation6], 1 }

</bundles_post_ra>
